<compile_context>
chip_gen: v5e
topology: v5e:2x2
jax: 0.10.0
libtpu: 0.0.40
codegen_flags: <defaults>
</compile_context>

<pallas_src>
import jax
import jax.numpy as jnp
from jax.experimental import pallas as pl
from jax.experimental.pallas import tpu as pltpu

N_HEAD = 8
D_K = 64
D_V = 64
LN_EPS = 1e-6


def _twitter_roberta_layer_kernel(
    x_ref,      # (B, S, H)   contextual embeddings, f32 (residual stays f32)
    wq_ref,     # (H, DK)     this head's query projection, bf16, pre-scaled 1/sqrt(dk)
    wk_ref,     # (H, DK)     this head's key projection, bf16
    wv_ref,     # (H, DV)     this head's value projection, bf16
    wfc_ref,    # (DV, H)     this head's slice of the output projection, bf16
    ln_g_ref,   # (1, H)      LayerNorm gamma, f32
    ln_b_ref,   # (1, H)      LayerNorm beta, f32
    wlin_ref,   # (H, LP)     classifier weight (transposed, lane-padded), bf16
    blin_ref,   # (1, LP)     classifier bias (lane-padded), f32
    out_ref,    # (B, LP)     lane-padded logits, f32
    ctx_acc,    # (B*S, H)    f32 scratch: sum over heads of per-head fc outputs
):
    h = pl.program_id(0)
    B, S, H = x_ref.shape

    x2d = x_ref[...].reshape(B * S, H)          # f32, reused as the residual
    xb = x2d.astype(jnp.bfloat16)               # bf16 MXU operand

    @pl.when(h == 0)
    def _init():
        ctx_acc[...] = jnp.zeros_like(ctx_acc)

    # ---- this head's Q/K/V projections (1/sqrt(dk) already folded into wq)
    q = jnp.dot(xb, wq_ref[...], preferred_element_type=jnp.float32)
    k = jnp.dot(xb, wk_ref[...], preferred_element_type=jnp.float32)
    v = jnp.dot(xb, wv_ref[...], preferred_element_type=jnp.float32)
    q3 = q.reshape(B, S, -1).astype(jnp.bfloat16)
    k3 = k.reshape(B, S, -1).astype(jnp.bfloat16)
    v3 = v.reshape(B, S, -1).astype(jnp.bfloat16)

    # ---- scaled-dot-product attention (mask=None), batched over B
    s = jnp.einsum('bqd,bkd->bqk', q3, k3, preferred_element_type=jnp.float32)
    m = jnp.max(s, axis=-1, keepdims=True)
    e = jnp.exp(s - m)
    denom = jnp.sum(e, axis=-1, keepdims=True)
    p = (e * pl.reciprocal(denom, approx=True)).astype(jnp.bfloat16)
    o = jnp.einsum('bqk,bkd->bqd', p, v3, preferred_element_type=jnp.float32)

    # ---- this head's contribution to the fused output projection
    o2d = o.reshape(B * S, -1).astype(jnp.bfloat16)
    ctx_acc[...] += jnp.dot(o2d, wfc_ref[...], preferred_element_type=jnp.float32)

    # ---- finalize: residual + LayerNorm, sum over S, ReLU, classifier
    @pl.when(h == pl.num_programs(0) - 1)
    def _finalize():
        y = ctx_acc[...] + x2d
        mean = jnp.mean(y, axis=-1, keepdims=True)
        mean_sq = jnp.mean(y * y, axis=-1, keepdims=True)
        var = jnp.maximum(mean_sq - mean * mean, 0.0)    # one-pass LN stats
        y = (y - mean) * jax.lax.rsqrt(var + LN_EPS)
        y = y * ln_g_ref[...] + ln_b_ref[...]

        h_n = jnp.sum(y.reshape(B, S, H), axis=1)        # (B, H)
        h_n = jnp.maximum(h_n, 0.0)                      # dropout(eval)=id; ReLU
        logits = jnp.dot(h_n.astype(jnp.bfloat16), wlin_ref[...],
                         preferred_element_type=jnp.float32) + blin_ref[...]
        out_ref[...] = logits.astype(out_ref.dtype)


def prepare_params(raw):
    """One-time parameter prep (hoisted out of the per-call wrapper):
    head-major weight layout, 1/sqrt(d_k) folded into wq, bf16 casts for the
    MXU operands, classifier padded to a lane-dense (..., 128) layout."""
    H = raw['wq'].shape[0]
    L = raw['wlin_t'].shape[1]
    LP = ((L + 127) // 128) * 128
    inv_temp = 1.0 / (float(D_K) ** 0.5)

    def to_heads_in(w, d):   # (H, NH*d) -> (NH, H, d)
        return jnp.transpose(w.reshape(H, N_HEAD, d), (1, 0, 2))

    wlin_pad = jnp.zeros((H, LP), jnp.float32).at[:, :L].set(raw['wlin_t'])
    blin_pad = jnp.zeros((1, LP), jnp.float32).at[:, :L].set(raw['blin'])

    return dict(
        wq=(to_heads_in(raw['wq'], D_K) * inv_temp).astype(jnp.bfloat16),
        wk=to_heads_in(raw['wk'], D_K).astype(jnp.bfloat16),
        wv=to_heads_in(raw['wv'], D_V).astype(jnp.bfloat16),
        wfc=raw['wfc'].reshape(N_HEAD, D_V, H).astype(jnp.bfloat16),
        ln_g=raw['ln_g'].astype(jnp.float32),
        ln_b=raw['ln_b'].astype(jnp.float32),
        wlin=wlin_pad.astype(jnp.bfloat16),
        blin=blin_pad,
        num_labels=L,
    )


def twitter_roberta_layer(inputs, lens, mask, labels, emb_table, prep):
    """Matches forward(inputs, lens, mask, labels, features=None) in eval mode."""
    del lens, labels   # unused on the features=None path
    del mask           # attention_mask only feeds the (replaced) encoder; MHA mask=None
    # Glue: deterministic embedding lookup stands in for the RoBERTa encoder.
    embs = emb_table[inputs].astype(jnp.float32)         # (B, S, H)

    B, S, H = embs.shape
    LP = prep['wlin'].shape[1]
    L = prep['num_labels']

    def fixed(shape):
        n = len(shape)
        return pl.BlockSpec(shape, lambda h, _n=n: (0,) * _n)

    in_specs = [
        fixed((B, S, H)),                                    # x (resident across heads)
        pl.BlockSpec((None, H, D_K), lambda h: (h, 0, 0)),   # wq (per-head slab)
        pl.BlockSpec((None, H, D_K), lambda h: (h, 0, 0)),   # wk
        pl.BlockSpec((None, H, D_V), lambda h: (h, 0, 0)),   # wv
        pl.BlockSpec((None, D_V, H), lambda h: (h, 0, 0)),   # wfc
        fixed((1, H)),                                       # LayerNorm gamma
        fixed((1, H)),                                       # LayerNorm beta
        fixed((H, LP)),                                      # classifier weight
        fixed((1, LP)),                                      # classifier bias
    ]

    logits_pad = pl.pallas_call(
        _twitter_roberta_layer_kernel,
        out_shape=jax.ShapeDtypeStruct((B, LP), jnp.float32),
        grid_spec=pltpu.PrefetchScalarGridSpec(
            num_scalar_prefetch=0,
            grid=(N_HEAD,),
            in_specs=in_specs,
            out_specs=fixed((B, LP)),
            scratch_shapes=[pltpu.VMEM((B * S, H), jnp.float32)],
        ),
        compiler_params=pltpu.CompilerParams(
            # The head axis is a reduction (ctx accumulator) -> "arbitrary".
            # NOTE(v7x): at production sizes add a leading "parallel"
            # batch/q-block axis so both TensorCores are engaged, and raise
            # vmem_limit_bytes for the flash-style tiles.
            dimension_semantics=("arbitrary",),
        ),
    )(embs, prep['wq'], prep['wk'], prep['wv'], prep['wfc'],
      prep['ln_g'], prep['ln_b'], prep['wlin'], prep['blin'])

    return logits_pad[:, :L]


if __name__ == "__main__":
    # Small shapes consistent with the module: hidden_size=32, 8 heads,
    # d_k=d_v=64, num_labels=3, batch=2, seq=8.
    B, S, H = 2, 8, 32
    L = 3
    VOCAB = 100

    key = jax.random.PRNGKey(0)
    keys = jax.random.split(key, 8)

    def xavier_normal(k, shape, fan_in, fan_out, gain=1.0):
        # gain = nn.init.calculate_gain('sigmoid') == 1.0
        std = gain * (2.0 / (fan_in + fan_out)) ** 0.5
        return jax.random.normal(k, shape, jnp.float32) * std

    emb_table = jax.random.normal(keys[0], (VOCAB, H), jnp.float32) * 0.02

    raw_params = dict(
        # nn.Linear(H, NH*DK, bias=False).weight is (NH*DK, H); we keep its
        # transpose (H, NH*DK) so q = x @ wq.
        wq=xavier_normal(keys[1], (H, N_HEAD * D_K), H, N_HEAD * D_K),
        wk=xavier_normal(keys[2], (H, N_HEAD * D_K), H, N_HEAD * D_K),
        wv=xavier_normal(keys[3], (H, N_HEAD * D_V), H, N_HEAD * D_V),
        # nn.Linear(NH*DV, H, bias=False).weight is (H, NH*DV); transposed.
        wfc=xavier_normal(keys[4], (N_HEAD * D_V, H), N_HEAD * D_V, H),
        ln_g=jnp.ones((1, H), jnp.float32),
        ln_b=jnp.zeros((1, H), jnp.float32),
        # nn.Linear(H, L).weight is (L, H); pass its transpose (H, L).
        wlin_t=xavier_normal(keys[5], (H, L), H, L),
        blin=jnp.zeros((1, L), jnp.float32),
    )
    prep = prepare_params(raw_params)

    inputs = jax.random.randint(keys[6], (B, S), 0, VOCAB, dtype=jnp.int32)
    lens = jnp.full((B,), S, dtype=jnp.int32)
    mask = jnp.ones((B, S), dtype=jnp.int32)
    labels = jnp.zeros((B,), dtype=jnp.int32)

    logits = twitter_roberta_layer(inputs, lens, mask, labels, emb_table, prep)
    jax.block_until_ready(logits)
    assert logits.shape == (B, L) and logits.dtype == jnp.float32
    assert bool(jnp.all(jnp.isfinite(logits)))
    print("KERNEL_OK")
</pallas_src>

<mosaic_0001>
module attributes {stable_mosaic.version = 11 : i64} {
  func.func @_twitter_roberta_layer_kernel(%arg0: i32, %arg1: memref<2x8x32xf32, #tpu.memory_space<vmem>>, %arg2: memref<1x32x64xbf16, #tpu.memory_space<vmem>>, %arg3: memref<1x32x64xbf16, #tpu.memory_space<vmem>>, %arg4: memref<1x32x64xbf16, #tpu.memory_space<vmem>>, %arg5: memref<1x64x32xbf16, #tpu.memory_space<vmem>>, %arg6: memref<1x32xf32, #tpu.memory_space<vmem>>, %arg7: memref<1x32xf32, #tpu.memory_space<vmem>>, %arg8: memref<32x128xbf16, #tpu.memory_space<vmem>>, %arg9: memref<1x128xf32, #tpu.memory_space<vmem>>, %arg10: memref<2x128xf32, #tpu.memory_space<vmem>>, %arg11: memref<16x32xf32, #tpu.memory_space<vmem>>) attributes {dimension_semantics = [#tpu.dimension_semantics<arbitrary>], iteration_bounds = array<i64: 8>, scalar_prefetch = 0 : i64, scratch_operands = 1 : i64, tpu.core_type = #tpu.core_type<tc>, window_params = [{pipeline_mode = #tpu.pipeline_mode<synchronous>, transform_indices = @transform_0, window_bounds = array<i64: 2, 8, 32>}, {transform_indices = @transform_1, window_bounds = array<i64: 1, 32, 64>}, {transform_indices = @transform_2, window_bounds = array<i64: 1, 32, 64>}, {transform_indices = @transform_3, window_bounds = array<i64: 1, 32, 64>}, {transform_indices = @transform_4, window_bounds = array<i64: 1, 64, 32>}, {pipeline_mode = #tpu.pipeline_mode<synchronous>, transform_indices = @transform_5, window_bounds = array<i64: 1, 32>}, {pipeline_mode = #tpu.pipeline_mode<synchronous>, transform_indices = @transform_6, window_bounds = array<i64: 1, 32>}, {pipeline_mode = #tpu.pipeline_mode<synchronous>, transform_indices = @transform_7, window_bounds = array<i64: 32, 128>}, {pipeline_mode = #tpu.pipeline_mode<synchronous>, transform_indices = @transform_8, window_bounds = array<i64: 1, 128>}, {pipeline_mode = #tpu.pipeline_mode<synchronous>, transform_indices = @transform_9, window_bounds = array<i64: 2, 128>}]} {
    %c0 = arith.constant 0 : index
    %c0_0 = arith.constant 0 : index
    %c0_1 = arith.constant 0 : index
    %0 = vector.load %arg1[%c0, %c0_0, %c0_1] : memref<2x8x32xf32, #tpu.memory_space<vmem>>, vector<2x8x32xf32>
    %1 = vector.shape_cast %0 : vector<2x8x32xf32> to vector<16x32xf32>
    %2 = arith.truncf %1 : vector<16x32xf32> to vector<16x32xbf16>
    %c0_i32 = arith.constant 0 : i32
    %3 = arith.cmpi eq, %arg0, %c0_i32 : i32
    %4 = arith.extui %3 : i1 to i32
    %c0_i32_2 = arith.constant 0 : i32
    %5 = arith.cmpi ne, %4, %c0_i32_2 : i32
    scf.if %5 {
      %cst_27 = arith.constant 0.000000e+00 : f32
      %45 = vector.broadcast %cst_27 : f32 to vector<16x32xf32>
      %c0_28 = arith.constant 0 : index
      %c0_29 = arith.constant 0 : index
      %46 = vector.load %arg11[%c0_28, %c0_29] : memref<16x32xf32, #tpu.memory_space<vmem>>, vector<16x32xf32>
      tpu.vector_store %arg11[%c0_28, %c0_29], %45 {strides = array<i32>} : memref<16x32xf32, #tpu.memory_space<vmem>>, vector<16x32xf32>,
    } else {
    }
    %c0_3 = arith.constant 0 : index
    %c0_4 = arith.constant 0 : index
    %c0_5 = arith.constant 0 : index
    %6 = vector.load %arg2[%c0_3, %c0_4, %c0_5] : memref<1x32x64xbf16, #tpu.memory_space<vmem>>, vector<1x32x64xbf16>
    %7 = vector.shape_cast %6 : vector<1x32x64xbf16> to vector<32x64xbf16>
    %cst = arith.constant dense<0.000000e+00> : vector<16x64xf32>
    %8 = tpu.matmul %2, %7, %cst {dimension_numbers = #tpu.dot_dimension_numbers<[1], [0], [0], [1], [0, 0, 1, 1], [], []>} : vector<16x32xbf16>, vector<32x64xbf16>, vector<16x64xf32> -> vector<16x64xf32>
    %c0_6 = arith.constant 0 : index
    %c0_7 = arith.constant 0 : index
    %c0_8 = arith.constant 0 : index
    %9 = vector.load %arg3[%c0_6, %c0_7, %c0_8] : memref<1x32x64xbf16, #tpu.memory_space<vmem>>, vector<1x32x64xbf16>
    %10 = vector.shape_cast %9 : vector<1x32x64xbf16> to vector<32x64xbf16>
    %cst_9 = arith.constant dense<0.000000e+00> : vector<16x64xf32>
    %11 = tpu.matmul %2, %10, %cst_9 {dimension_numbers = #tpu.dot_dimension_numbers<[1], [0], [0], [1], [0, 0, 1, 1], [], []>} : vector<16x32xbf16>, vector<32x64xbf16>, vector<16x64xf32> -> vector<16x64xf32>
    %c0_10 = arith.constant 0 : index
    %c0_11 = arith.constant 0 : index
    %c0_12 = arith.constant 0 : index
    %12 = vector.load %arg4[%c0_10, %c0_11, %c0_12] : memref<1x32x64xbf16, #tpu.memory_space<vmem>>, vector<1x32x64xbf16>
    %13 = vector.shape_cast %12 : vector<1x32x64xbf16> to vector<32x64xbf16>
    %cst_13 = arith.constant dense<0.000000e+00> : vector<16x64xf32>
    %14 = tpu.matmul %2, %13, %cst_13 {dimension_numbers = #tpu.dot_dimension_numbers<[1], [0], [0], [1], [0, 0, 1, 1], [], []>} : vector<16x32xbf16>, vector<32x64xbf16>, vector<16x64xf32> -> vector<16x64xf32>
    %15 = vector.shape_cast %8 : vector<16x64xf32> to vector<2x8x64xf32>
    %16 = arith.truncf %15 : vector<2x8x64xf32> to vector<2x8x64xbf16>
    %17 = vector.shape_cast %11 : vector<16x64xf32> to vector<2x8x64xf32>
    %18 = arith.truncf %17 : vector<2x8x64xf32> to vector<2x8x64xbf16>
    %19 = vector.shape_cast %14 : vector<16x64xf32> to vector<2x8x64xf32>
    %20 = arith.truncf %19 : vector<2x8x64xf32> to vector<2x8x64xbf16>
    "tpu.trace_start"() <{level = 10 : i32, message = "bqd,bkd->bqk"}> : () -> ()
    %cst_14 = arith.constant dense<0.000000e+00> : vector<2x8x8xf32>
    %21 = tpu.matmul %16, %18, %cst_14 {dimension_numbers = #tpu.dot_dimension_numbers<[2], [2], [1], [1], [0, 0, 0, 1, 1, 1], [0], [0]>} : vector<2x8x64xbf16>, vector<2x8x64xbf16>, vector<2x8x8xf32> -> vector<2x8x8xf32>
    "tpu.trace_stop"() : () -> ()
    %cst_15 = arith.constant dense<0xFF800000> : vector<2x8xf32>
    %22 = vector.multi_reduction <maximumf>, %21, %cst_15 [2] : vector<2x8x8xf32> to vector<2x8xf32>
    %23 = vector.shape_cast %22 : vector<2x8xf32> to vector<2x8x1xf32>
    %24 = vector.broadcast %23 : vector<2x8x1xf32> to vector<2x8x8xf32>
    %25 = arith.subf %21, %24 : vector<2x8x8xf32>
    %26 = math.exp %25 : vector<2x8x8xf32>
    %cst_16 = arith.constant dense<0.000000e+00> : vector<2x8xf32>
    %27 = vector.multi_reduction <add>, %26, %cst_16 [2] : vector<2x8x8xf32> to vector<2x8xf32>
    %28 = vector.shape_cast %27 : vector<2x8xf32> to vector<2x8x1xf32>
    %29 = tpu.reciprocal %28 {approx = true} : vector<2x8x1xf32> -> vector<2x8x1xf32>
    %30 = vector.broadcast %29 : vector<2x8x1xf32> to vector<2x8x8xf32>
    %31 = arith.mulf %26, %30 : vector<2x8x8xf32>
    %32 = arith.truncf %31 : vector<2x8x8xf32> to vector<2x8x8xbf16>
    "tpu.trace_start"() <{level = 10 : i32, message = "bqk,bkd->bqd"}> : () -> ()
    %cst_17 = arith.constant dense<0.000000e+00> : vector<2x8x64xf32>
    %33 = tpu.matmul %32, %20, %cst_17 {dimension_numbers = #tpu.dot_dimension_numbers<[2], [1], [1], [2], [0, 0, 0, 1, 1, 2], [0], [0]>} : vector<2x8x8xbf16>, vector<2x8x64xbf16>, vector<2x8x64xf32> -> vector<2x8x64xf32>
    "tpu.trace_stop"() : () -> ()
    %34 = vector.shape_cast %33 : vector<2x8x64xf32> to vector<16x64xf32>
    %35 = arith.truncf %34 : vector<16x64xf32> to vector<16x64xbf16>
    %c0_18 = arith.constant 0 : index
    %c0_19 = arith.constant 0 : index
    %36 = vector.load %arg11[%c0_18, %c0_19] : memref<16x32xf32, #tpu.memory_space<vmem>>, vector<16x32xf32>
    %c0_20 = arith.constant 0 : index
    %c0_21 = arith.constant 0 : index
    %c0_22 = arith.constant 0 : index
    %37 = vector.load %arg5[%c0_20, %c0_21, %c0_22] : memref<1x64x32xbf16, #tpu.memory_space<vmem>>, vector<1x64x32xbf16>
    %38 = vector.shape_cast %37 : vector<1x64x32xbf16> to vector<64x32xbf16>
    %cst_23 = arith.constant dense<0.000000e+00> : vector<16x32xf32>
    %39 = tpu.matmul %35, %38, %cst_23 {dimension_numbers = #tpu.dot_dimension_numbers<[1], [0], [0], [1], [0, 0, 1, 1], [], []>} : vector<16x64xbf16>, vector<64x32xbf16>, vector<16x32xf32> -> vector<16x32xf32>
    %40 = arith.addf %36, %39 : vector<16x32xf32>
    %c0_24 = arith.constant 0 : index
    %c0_25 = arith.constant 0 : index
    %41 = vector.load %arg11[%c0_24, %c0_25] : memref<16x32xf32, #tpu.memory_space<vmem>>, vector<16x32xf32>
    tpu.vector_store %arg11[%c0_24, %c0_25], %40 {strides = array<i32>} : memref<16x32xf32, #tpu.memory_space<vmem>>, vector<16x32xf32>,
    %c7_i32 = arith.constant 7 : i32
    %42 = arith.cmpi eq, %arg0, %c7_i32 : i32
    %43 = arith.extui %42 : i1 to i32
    %c0_i32_26 = arith.constant 0 : i32
    %44 = arith.cmpi ne, %43, %c0_i32_26 : i32
    scf.if %44 {
      %c0_27 = arith.constant 0 : index
      %c0_28 = arith.constant 0 : index
      %45 = vector.load %arg11[%c0_27, %c0_28] : memref<16x32xf32, #tpu.memory_space<vmem>>, vector<16x32xf32>
      %46 = arith.addf %45, %1 : vector<16x32xf32>
      %cst_29 = arith.constant dense<0.000000e+00> : vector<16xf32>
      %47 = vector.multi_reduction <add>, %46, %cst_29 [1] : vector<16x32xf32> to vector<16xf32>
      %48 = vector.shape_cast %47 : vector<16xf32> to vector<16x1xf32>
      %cst_30 = arith.constant 3.200000e+01 : f32
      %49 = vector.broadcast %cst_30 : f32 to vector<16x1xf32>
      %50 = arith.divf %48, %49 : vector<16x1xf32>
      %51 = arith.mulf %46, %46 : vector<16x32xf32>
      %cst_31 = arith.constant dense<0.000000e+00> : vector<16xf32>
      %52 = vector.multi_reduction <add>, %51, %cst_31 [1] : vector<16x32xf32> to vector<16xf32>
      %53 = vector.shape_cast %52 : vector<16xf32> to vector<16x1xf32>
      %cst_32 = arith.constant 3.200000e+01 : f32
      %54 = vector.broadcast %cst_32 : f32 to vector<16x1xf32>
      %55 = arith.divf %53, %54 : vector<16x1xf32>
      %56 = arith.mulf %50, %50 : vector<16x1xf32>
      %57 = arith.subf %55, %56 : vector<16x1xf32>
      %cst_33 = arith.constant 0.000000e+00 : f32
      %58 = vector.broadcast %cst_33 : f32 to vector<16x1xf32>
      %59 = arith.maximumf %57, %58 : vector<16x1xf32>
      %60 = vector.broadcast %50 : vector<16x1xf32> to vector<16x32xf32>
      %61 = arith.subf %46, %60 : vector<16x32xf32>
      %cst_34 = arith.constant 9.99999997E-7 : f32
      %62 = vector.broadcast %cst_34 : f32 to vector<16x1xf32>
      %63 = arith.addf %59, %62 : vector<16x1xf32>
      %64 = math.rsqrt %63 : vector<16x1xf32>
      %65 = vector.broadcast %64 : vector<16x1xf32> to vector<16x32xf32>
      %66 = arith.mulf %61, %65 : vector<16x32xf32>
      %c0_35 = arith.constant 0 : index
      %c0_36 = arith.constant 0 : index
      %67 = vector.load %arg6[%c0_35, %c0_36] : memref<1x32xf32, #tpu.memory_space<vmem>>, vector<1x32xf32>
      %68 = vector.broadcast %67 : vector<1x32xf32> to vector<16x32xf32>
      %69 = arith.mulf %66, %68 : vector<16x32xf32>
      %c0_37 = arith.constant 0 : index
      %c0_38 = arith.constant 0 : index
      %70 = vector.load %arg7[%c0_37, %c0_38] : memref<1x32xf32, #tpu.memory_space<vmem>>, vector<1x32xf32>
      %71 = vector.broadcast %70 : vector<1x32xf32> to vector<16x32xf32>
      %72 = arith.addf %69, %71 : vector<16x32xf32>
      %73 = vector.shape_cast %72 : vector<16x32xf32> to vector<2x8x32xf32>
      %cst_39 = arith.constant dense<0.000000e+00> : vector<2x32xf32>
      %74 = vector.multi_reduction <add>, %73, %cst_39 [1] : vector<2x8x32xf32> to vector<2x32xf32>
      %cst_40 = arith.constant 0.000000e+00 : f32
      %75 = vector.broadcast %cst_40 : f32 to vector<2x32xf32>
      %76 = arith.maximumf %74, %75 : vector<2x32xf32>
      %77 = arith.truncf %76 : vector<2x32xf32> to vector<2x32xbf16>
      %c0_41 = arith.constant 0 : index
      %c0_42 = arith.constant 0 : index
      %78 = vector.load %arg8[%c0_41, %c0_42] : memref<32x128xbf16, #tpu.memory_space<vmem>>, vector<32x128xbf16>
      %cst_43 = arith.constant dense<0.000000e+00> : vector<2x128xf32>
      %79 = tpu.matmul %77, %78, %cst_43 {dimension_numbers = #tpu.dot_dimension_numbers<[1], [0], [0], [1], [0, 0, 1, 1], [], []>} : vector<2x32xbf16>, vector<32x128xbf16>, vector<2x128xf32> -> vector<2x128xf32>
      %c0_44 = arith.constant 0 : index
      %c0_45 = arith.constant 0 : index
      %80 = vector.load %arg9[%c0_44, %c0_45] : memref<1x128xf32, #tpu.memory_space<vmem>>, vector<1x128xf32>
      %81 = vector.broadcast %80 : vector<1x128xf32> to vector<2x128xf32>
      %82 = arith.addf %79, %81 : vector<2x128xf32>
      %c0_46 = arith.constant 0 : index
      %c0_47 = arith.constant 0 : index
      %83 = vector.load %arg10[%c0_46, %c0_47] : memref<2x128xf32, #tpu.memory_space<vmem>>, vector<2x128xf32>
      tpu.vector_store %arg10[%c0_46, %c0_47], %82 {strides = array<i32>} : memref<2x128xf32, #tpu.memory_space<vmem>>, vector<2x128xf32>,
    } else {
    }
    return
  }
  func.func @transform_0(%arg0: i32) -> (i32, i32, i32) {
    %c0_i32 = arith.constant 0 : i32
    %c0_i32_0 = arith.constant 0 : i32
    %c0_i32_1 = arith.constant 0 : i32
    %c0_i32_2 = arith.constant 0 : i32
    return %c0_i32, %c0_i32_0, %c0_i32_1 : i32, i32, i32
  }
  func.func @transform_1(%arg0: i32) -> (i32, i32, i32) {
    %c0_i32 = arith.constant 0 : i32
    %c0_i32_0 = arith.constant 0 : i32
    %c0_i32_1 = arith.constant 0 : i32
    return %arg0, %c0_i32, %c0_i32_0 : i32, i32, i32
  }
  func.func @transform_2(%arg0: i32) -> (i32, i32, i32) {
    %c0_i32 = arith.constant 0 : i32
    %c0_i32_0 = arith.constant 0 : i32
    %c0_i32_1 = arith.constant 0 : i32
    return %arg0, %c0_i32, %c0_i32_0 : i32, i32, i32
  }
  func.func @transform_3(%arg0: i32) -> (i32, i32, i32) {
    %c0_i32 = arith.constant 0 : i32
    %c0_i32_0 = arith.constant 0 : i32
    %c0_i32_1 = arith.constant 0 : i32
    return %arg0, %c0_i32, %c0_i32_0 : i32, i32, i32
  }
  func.func @transform_4(%arg0: i32) -> (i32, i32, i32) {
    %c0_i32 = arith.constant 0 : i32
    %c0_i32_0 = arith.constant 0 : i32
    %c0_i32_1 = arith.constant 0 : i32
    return %arg0, %c0_i32, %c0_i32_0 : i32, i32, i32
  }
  func.func @transform_5(%arg0: i32) -> (i32, i32) {
    %c0_i32 = arith.constant 0 : i32
    %c0_i32_0 = arith.constant 0 : i32
    %c0_i32_1 = arith.constant 0 : i32
    return %c0_i32, %c0_i32_0 : i32, i32
  }
  func.func @transform_6(%arg0: i32) -> (i32, i32) {
    %c0_i32 = arith.constant 0 : i32
    %c0_i32_0 = arith.constant 0 : i32
    %c0_i32_1 = arith.constant 0 : i32
    return %c0_i32, %c0_i32_0 : i32, i32
  }
  func.func @transform_7(%arg0: i32) -> (i32, i32) {
    %c0_i32 = arith.constant 0 : i32
    %c0_i32_0 = arith.constant 0 : i32
    %c0_i32_1 = arith.constant 0 : i32
    return %c0_i32, %c0_i32_0 : i32, i32
  }
  func.func @transform_8(%arg0: i32) -> (i32, i32) {
    %c0_i32 = arith.constant 0 : i32
    %c0_i32_0 = arith.constant 0 : i32
    %c0_i32_1 = arith.constant 0 : i32
    return %c0_i32, %c0_i32_0 : i32, i32
  }
  func.func @transform_9(%arg0: i32) -> (i32, i32) {
    %c0_i32 = arith.constant 0 : i32
    %c0_i32_0 = arith.constant 0 : i32
    %c0_i32_1 = arith.constant 0 : i32
    return %c0_i32, %c0_i32_0 : i32, i32
  }
}

</mosaic_0001>

<bundles_post_ra>
// kernel: tpu_custom_call.1
= control target key start
LH: loop header
LB: loop body
LE: loop exit
PB: predicated region body
PF: predicated region fallthrough
CT: control target
= control target key end

     0   :  { %14 = vsyncpa [#allocation4], 0  ;;  %s1365_s0 = inlined_call_operand.hbm [shape: f32[2,8,32], index: 0, kind: input, shape index: {}]   ;;  %s1366_s1 = inlined_call_operand.vmem [shape: bf16[8,32,64], index: 1, kind: input, shape index: {}]   ;;  %s1367_s2 = inlined_call_operand.vmem [shape: bf16[8,32,64], index: 2, kind: input, shape index: {}]   ;;  %s1368_s3 = inlined_call_operand.vmem [shape: bf16[8,32,64], index: 3, kind: input, shape index: {}]   ;;  %s1369_s4 = inlined_call_operand.vmem [shape: bf16[8,64,32], index: 4, kind: input, shape index: {}]   ;;  %s1370_s5 = inlined_call_operand.vmem [shape: f32[1,32], index: 5, kind: input, shape index: {}]   ;;  %s1371_s6 = inlined_call_operand.vmem [shape: f32[1,32], index: 6, kind: input, shape index: {}]   ;;  %s1372_s7 = inlined_call_operand.hbm [shape: bf16[32,128], index: 7, kind: input, shape index: {}]   ;;  %s1373_s8 = inlined_call_operand.vmem [shape: f32[1,128], index: 8, kind: input, shape index: {}]   ;;  %s1374_s9 = inlined_call_operand.hbm [shape: f32[2,128], index: 9, kind: output, shape index: {}]  }
   0x1   :  { %15 = vsyncpa [#allocation7], 0 }
   0x2   :  { %16 = vsyncpa [#allocation5], 0  ;;  %s1249_s30 = smov 0  }
   0x3 LB: > { %s268_s12 = sshll.u32 %s1365_s0, 4  ;;  %s1258_s13 = sadd.s32 4294967295, %s1188_s30   ;;  %s1188_s30 = sphi %s1249_s30, %s22_s30   ;;  %s269_s12 = int_to_ptr.hbm [resolvable:$true] %s268_s12 }
   0x4   : > { %p929_p0 = scmp.ge.s32.totalorder %s1188_s30, 1  ;;  %p257_p1 = scmp.lt.s32.totalorder %s1188_s30, 9 }
   0x5   : > { %p930_p2 = scmp.ne.s32.totalorder %s1258_s13, 0  ;;  %p1042_p3 = scmp.eq.s32.totalorder %s1258_s13, 0 }
   0x6   : > { %p1264_p4 = pnand %p929_p0, %p257_p1  ;;  %s1190_s15 = smov [#allocation3]  }
   0x7   : > { %s270_s16 = sshll.u32 %s1190_s15, 4  ;;  %s288_s19 = sshll.u32 %s1372_s7, 4  ;;  %s271_s16 = int_to_ptr.vmem [resolvable:$true] %s270_s16  ;;  %s289_s19 = int_to_ptr.hbm [resolvable:$true] %s288_s19 }
   0x8   : > { %p1035_p5 = pneg %p1264_p4  ;;  %s1191_s20 = smov [#allocation6]  }
   0x9   : > { %s290_s21 = sshll.u32 %s1191_s20, 4  ;;  %s1192_s22 = smov 128   ;;  %s291_s21 = int_to_ptr.vmem [resolvable:$true] %s290_s21 }
   0xa   : > { %p1036_p6 = pnand %p1042_p3, %p1035_p5  ;;  %s1193_s23 = smov 8  }
   0xb   : > { %s1194_s24 = smov 64   ;;  %s1195_s25 = smov 4  }
   0xc   : > { %1038 = dma.hbm_to_vmem [thread:$0]  (!%p1036_p6), %s269_s12, 256, %s271_s16, [#allocation4], %s1192_s22, %s1192_s22, %s1193_s23  }
   0xd   : > { %1041 = dma.hbm_to_vmem [thread:$0]  (!%p1036_p6), %s289_s19, 256, %s291_s21, [#allocation7], %s1194_s24, %s1194_s24, %s1195_s25  }
   0xe   : > { %341 = sbr.rel (%p1264_p4) target bundleno = 1169 (0x491), region = 56 }
  0x13   : > { %1175 = dma.done.wait (%p1042_p3), [#allocation4], 256  }
  0x14   : > { %1177 = vsyncadd (%p1042_p3), [#allocation4], 4294967040 }
  0x15   : > { %1179 = dma.done.wait (%p1042_p3), [#allocation7], 256  }
  0x16   : > { %1181 = vsyncadd (%p1042_p3), [#allocation7], 4294967040  ;;  %p393_p7 = scmp.lt.s32.totalorder %s1258_s13, 7  ;;  %v1303_v0 = vld [vmem:[#allocation3] sm:$0xff]  ;;  %v1305_v1 = vld [vmem:[#allocation3 + $0x8] sm:$0xff] }
  0x17   : > { %v416_v2 = vpack.c.bf16 %v1305_v1, %v1303_v0 }
  0x18   : > { %s394_s26 = scalar_select %p393_p7, %s1258_s13, 7 }
  0x19   : > { %420 = sbr.rel (%p930_p2) target bundleno = 33 (0x21), region = 68 }
  0x1a   : > { %s1007_s27 = sshll.u32 %s394_s26, 4  ;;  %s1010_s28 = sshll.u32 %s394_s26, 5 }
  0x1b   : > { %s397_s11 = scalar_lea.vmem %s1366_s1, %s1007_s27  ;;  %s402_s15 = scalar_lea.vmem %s1367_s2, %s1007_s27 }
  0x1c   : > { %s1296_s18 = scalar_lea.vmem %s1368_s3, %s1007_s27  ;;  %s1301_s21 = scalar_lea.vmem %s1369_s4, %s1010_s28 }
  0x1e   : > { %vm421_vm0 = vcmask 261120   ;;  %v1196_v3 = vmov 0.0  }
  0x1f   : > { %422 = vst.msk [vmem:[#allocation2] sm:$0xff] %vm421_vm0, %v1196_v3 }
  0x20   : > { %423 = vst.msk [vmem:[#allocation2 + $0x8] sm:$0xff] %vm421_vm0, %v1196_v3 }
  0x21 PF: > { %v1014_v4 = vld [vmem:[%s402_s15 + $0x8] sm:$0xff]  ;;  %v1013_v6 = vld [vmem:[%s402_s15] sm:$0xff]  ;;  %vm440_vm1 = vcmask 261120   ;;  %vm524_vm2 = vcmask 523264   ;;  %vm563_vm3 = vcmask 64512   ;;  %vm591_vm4 = vcmask 1043456  }
  0x22   : > { %v1012_v5 = vld [vmem:[%s397_s11 + $0x8] sm:$0xff]  ;;  %480 = vmatpush.bf16.msra.mxu1 %v1014_v4  ;;  %v1011_v7 = vld [vmem:[%s397_s11] sm:$0xff]  ;;  %v1020_v42 = vld [vmem:[%s1301_s21 + $0x18] sm:$0xff]  ;;  %p993_p8 = scmp.ne.s32.totalorder %s1258_s13, 7 }
  0x23   : > { %450 = vmatpush.bf16.msra.mxu0 %v1012_v5  ;;  %v1016_v18 = vld [vmem:[%s1296_s18 + $0x8] sm:$0xff]  ;;  %v1015_v19 = vld [vmem:[%s1296_s18] sm:$0xff]  ;;  %v1019_v43 = vld [vmem:[%s1301_s21 + $0x10] sm:$0xff] }
  0x24   : > { %510 = vmatpush.bf16.msra.mxu2 %v1016_v18  ;;  %v1018_v44 = vld [vmem:[%s1301_s21 + $0x8] sm:$0xff]  ;;  %v1017_v53 = vld [vmem:[%s1301_s21] sm:$0xff] }
  0x26   : > { %481 = vmatpush.bf16.msra.mxu1 %v1013_v6  ;;  %v628_v59 = vld [vmem:[#allocation2] sm:$0xff] }
  0x27   : > { %451 = vmatpush.bf16.msra.mxu0 %v1011_v7  ;;  %v629_v62 = vld [vmem:[#allocation2 + $0x8] sm:$0xff] }
  0x28   : > { %511 = vmatpush.bf16.msra.mxu2 %v1015_v19 }
  0x29   : > { %962 = vmatmul.msk.bf16.vlgmr.msra.gmra.mxu1 %vm440_vm1, %v416_v2 }
  0x2a   : > { %953 = vmatmul.msk.bf16.vlgmr.msra.gmra.mxu0 %vm440_vm1, %v416_v2 }
  0x2b   : > { %971 = vmatmul.msk.bf16.vlgmr.msra.gmra.mxu2 %vm440_vm1, %v416_v2 }
  0xa6   : > { %v483_v8 = vpop.f32.mrf.mxu1 }
  0xa7   : > { %v520_v9 = vpack.c.bf16 %v483_v8, %v483_v8  ;;  %v453_v11 = vpop.f32.mrf.mxu0 }
  0xa8   : > { %v518_v12 = vpack.c.bf16 %v453_v11, %v453_v11 }
  0xa9   : > { %v529_v10 = vsel %vm524_vm2, %v520_v9, 0 }
  0xaa   : > { %538 = vmatpush.bf16.xpose.msra.mxu3 %v529_v10 }
  0xae   : > { %v485_v13 = vpop.f32.mrf.mxu1  ;;  %v513_v28 = vpop.f32.mrf.mxu2 }
  0xaf   : > { %v521_v14 = vpack.c.bf16 %v485_v13, %v485_v13  ;;  %v455_v16 = vpop.f32.mrf.mxu0  ;;  %v522_v29 = vpack.c.bf16 %v513_v28, %v513_v28 }
  0xb0   : > { %v519_v17 = vpack.c.bf16 %v455_v16, %v455_v16 }
  0xb1   : > { %972 = vmatmul.msk.bf16.vlgmr.msra.gmra.mxu3 %vm524_vm2, %v518_v12  ;;  %v548_v15 = vsel %vm524_vm2, %v521_v14, 0  ;;  %v593_v31 = vsel %vm591_vm4, %v522_v29, 0 }
  0xb2   : > { %557 = vmatpush.bf16.xpose.msrb.mxu0 %v548_v15  ;;  %602 = vmatpush.bf16.msrb.mxu1 %v593_v31 }
  0xb3   : > { %669 = vmatpush.bf16.msrb.mxu3 %v1020_v42 }
  0xb6   : > { %v515_v34 = vpop.f32.mrf.mxu2 }
  0xb7   : > { %v523_v35 = vpack.c.bf16 %v515_v34, %v515_v34  ;;  %670 = vmatpush.bf16.msrb.mxu3 %v1019_v43 }
  0xb9   : > { %973 = vmatmul.msk.bf16.vlgmr.msrb.gmra.mxu0 %vm524_vm2, %v519_v17  ;;  %v612_v39 = vsel %vm591_vm4, %v523_v35, 0 }
  0xba   : > { %621 = vmatpush.bf16.msrb.mxu2 %v612_v39 }
  0xbb   : > { %671 = vmatpush.bf16.msrb.mxu3 %v1018_v44 }
  0xbf   : > { %672 = vmatpush.bf16.msrb.mxu3 %v1017_v53 }
 0x134   : > { %v540_v20 = vpop.f32.mrf.mxu3 }
 0x135   : > { %v564_v25 = vsel %vm563_vm3, %v540_v20, -inf }
 0x136   : > { %v559_v21 = vpop.f32.mrf.mxu0 }
 0x137   : > { %v567_v22 = vsel %vm563_vm3, %v559_v21, -inf }
 0x138   : > { %568 = vmax.xlane.f32.xlu0 %v567_v22 }
 0x13c   : > { %v542_v23 = vpop.f32.mrf.mxu3 }
 0x13e   : > { %v561_v24 = vpop.f32.mrf.mxu0 }
 0x140   : > { %565 = vmax.xlane.f32.xlu0 %v564_v25 }
 0x1ab   : > { %v569_v26 = vpop.xlane.xlu0 %568 }
 0x1ac   : > { %v571_v27 = vsub.f32 %v559_v21, %v569_v26 }
 0x1ae   : > { %v574_v30 = vmul.f32 1.442695, %v571_v27 }
 0x1b0   : > { %1065 = vpow2.f32 %v574_v30 }
 0x1b3   : > { %v566_v32 = vpop.xlane.xlu0 %565 }
 0x1b4   : > { %v570_v33 = vsub.f32 %v540_v20, %v566_v32 }
 0x1b6   : > { %v1066_v36 = vpop.eup %1065  ;;  %v572_v37 = vmul.f32 1.442695, %v570_v33 }
 0x1b7   : > { %v579_v38 = vsel %vm563_vm3, %v1066_v36, 0.0 }
 0x1b8   : > { %1067 = vpow2.f32 %v572_v37  ;;  %580 = vadd.xlane.f32.xlu1 %v579_v38 }
 0x1be   : > { %v1068_v40 = vpop.eup %1067 }
 0x1bf   : > { %v576_v41 = vsel %vm563_vm3, %v1068_v40, 0.0 }
 0x1c0   : > { %577 = vadd.xlane.f32.xlu1 %v576_v41 }
 0x22b   : > { %v581_v45 = vpop.xlane.xlu1 %580 }
 0x22c   : > { %1069 = vrcp.f32 %v581_v45 }
 0x232   : > { %v1070_v46 = vpop.eup %1069 }
 0x233   : > { %v585_v47 = vmul.f32 %v1070_v46, %v1066_v36  ;;  %v578_v48 = vpop.xlane.xlu1 %577 }
 0x234   : > { %1071 = vrcp.f32 %v578_v48 }
 0x235   : > { %v587_v49 = vpack.c.bf16 %v585_v47, %v585_v47 }
 0x237   : > { %975 = vmatmul.msk.bf16.vlgmr.msrb.gmra.mxu2 %vm563_vm3, %v587_v49 }
 0x23a   : > { %v1072_v50 = vpop.eup %1071 }
 0x23b   : > { %v584_v51 = vmul.f32 %v1072_v50, %v1068_v40 }
 0x23d   : > { %v586_v52 = vpack.c.bf16 %v584_v51, %v584_v51 }
 0x23f   : > { %974 = vmatmul.msk.bf16.vlgmr.msrb.gmra.mxu1 %vm563_vm3, %v586_v52 }
 0x2ba   : > { %v623_v54 = vpop.f32.mrf.mxu2 }
 0x2bc   : > { %v604_v55 = vpop.f32.mrf.mxu1 }
 0x2bd   : > { %v627_v56 = vpack.c.bf16 %v623_v54, %v604_v55 }
 0x2bf   : > { %992 = vmatmul.msk.bf16.vlgmr.msrb.gmra.mxu3 %vm524_vm2, %v627_v56 }
 0x2c2   : > { %v625_v57 = vpop.f32.mrf.mxu2 }
 0x2c4   : > { %v606_v58 = vpop.f32.mrf.mxu1 }
 0x342   : > { %v674_v60 = vpop.f32.mrf.mxu3 }
 0x343   : > { %v679_v61 = vadd.f32 %v674_v60, %v628_v59 }
 0x345   : > { %681 = vst.msk [vmem:[#allocation2] sm:$0xff] %vm440_vm1, %v679_v61 }
 0x349   : > { %686 = sbr.rel (%p993_p8) target bundleno = 1164 (0x48c), region = 72 }
 0x34a   : > { %v676_v63 = vpop.f32.mrf.mxu3 }
 0x34b   : > { %v680_v2 = vadd.f32 %v676_v63, %v629_v62 }
 0x34d   : > { %682 = vst.msk [vmem:[#allocation2 + $0x8] sm:$0xff] %vm440_vm1, %v680_v2 }
 0x34e   : > { %v687_v3 = vld [vmem:[#allocation2] sm:$0xff]  ;;  %v1022_v26 = vld [vmem:[#allocation6 + $0x8] sm:$0xff]  ;;  %vm790_vm12 = vcmask 1041409  }
 0x34f   : > { %v689_v5 = vadd.f32 %v687_v3, %v1303_v0  ;;  %v1197_v0 = vmov 32.0   ;;  %814 = vmatpush.bf16.msra.mxu0 %v1022_v26  ;;  %v1021_v30 = vld [vmem:[#allocation6] sm:$0xff] }
 0x350   : > { %1076 = vrcp.f32 %v1197_v0  ;;  %v1073_v44 = vld [vmem:[%s1370_s5] ss:$0 sm:$0xff] }
 0x351   : > { %v691_v6 = vsel %vm440_vm1, %v689_v5, 0.0  ;;  %v706_v7 = vmul.f32 %v689_v5, %v689_v5  ;;  %v1074_v49 = vld [vmem:[%s1371_s6] ss:$0 sm:$0xff] }
 0x352   : > { %692 = vadd.xlane.f32.xlu0 %v691_v6 }
 0x353   : > { %v708_v9 = vsel %vm440_vm1, %v706_v7, 0.0  ;;  %815 = vmatpush.bf16.msra.mxu0 %v1021_v30 }
 0x354   : > { %v688_v4 = vld [vmem:[#allocation2 + $0x8] sm:$0xff]  ;;  %709 = vadd.xlane.f32.xlu1 %v708_v9 }
 0x355   : > { %v1337_v8 = vadd.f32 %v688_v4, %v1305_v1 }
 0x356   : > { %v1077_v13 = vpop.eup %1076 }
 0x357   : > { %v707_v10 = vmul.f32 %v1337_v8, %v1337_v8  ;;  %v694_v11 = vsel %vm440_vm1, %v1337_v8, 0.0  ;;  %v698_v14 = vmul.f32 32.0, %v1077_v13  ;;  %vm702_vm5 = vweird.f32 %v1077_v13 }
 0x359   : > { %v711_v12 = vsel %vm440_vm1, %v707_v10, 0.0  ;;  %v699_v1 = vsub.f32 1.0, %v698_v14 }
 0x35a   : > { %695 = vadd.xlane.f32.xlu0 %v694_v11 }
 0x35b   : > { %v700_v15 = vmul.f32 %v1077_v13, %v699_v1 }
 0x35c   : > { %712 = vadd.xlane.f32.xlu1 %v711_v12 }
 0x35d   : > { %v701_v16 = vadd.f32 %v1077_v13, %v700_v15 }
 0x35f   : > { %v703_v17 = vsel %vm702_vm5, %v1077_v13, %v701_v16 }
 0x3c5   : > { %v693_v18 = vpop.xlane.xlu0 %692 }
 0x3c6   : > { %v704_v19 = vmul.f32 %v703_v17, %v693_v18  ;;  %v1075_v18 = vld [vmem:[%s1373_s8] ss:$0 sm:$0xff] }
 0x3c7   : > { %v710_v20 = vpop.xlane.xlu1 %709 }
 0x3c8   : > { %v716_v21 = vmul.f32 %v704_v19, %v704_v19  ;;  %v714_v22 = vmul.f32 %v710_v20, %v703_v17  ;;  %v722_v43 = vsub.f32 %v689_v5, %v704_v19 }
 0x3ca   : > { %v718_v23 = vsub.f32 %v714_v22, %v716_v21 }
 0x3cc   : > { %v720_v24 = vmax.f32 %v718_v23, 0.0 }
 0x3cd   : > { %v696_v25 = vpop.xlane.xlu0 %695 }
 0x3ce   : > { %v724_v27 = vadd.f32 1e-06, %v720_v24  ;;  %v705_v28 = vmul.f32 %v703_v17, %v696_v25 }
 0x3cf   : > { %v713_v29 = vpop.xlane.xlu1 %712 }
 0x3d0   : > { %1078 = vrsqrt.f32 %v724_v27  ;;  %v717_v31 = vmul.f32 %v705_v28, %v705_v28  ;;  %v715_v32 = vmul.f32 %v713_v29, %v703_v17  ;;  %vm732_vm7 = vweird.f32 %v724_v27 }
 0x3d1   : > { %v723_v56 = vsub.f32 %v1337_v8, %v705_v28 }
 0x3d2   : > { %v719_v33 = vsub.f32 %v715_v32, %v717_v31 }
 0x3d4   : > { %v721_v34 = vmax.f32 %v719_v33, 0.0 }
 0x3d6   : > { %v1079_v35 = vpop.eup %1078  ;;  %v725_v37 = vadd.f32 1e-06, %v721_v34 }
 0x3d7   : > { %v727_v36 = vmul.f32 %v1079_v35, %v724_v27  ;;  %vm733_vm6 = vweird.f32 %v1079_v35 }
 0x3d8   : > { %1080 = vrsqrt.f32 %v725_v37  ;;  %vm734_vm8 = vmor %vm732_vm7, %vm733_vm6  ;;  %vm742_vm10 = vweird.f32 %v725_v37 }
 0x3d9   : > { %v728_v38 = vmul.f32 %v1079_v35, %v727_v36 }
 0x3db   : > { %v729_v39 = vmul.f32 0.5, %v728_v38 }
 0x3dd   : > { %v730_v40 = vsub.f32 1.5, %v729_v39 }
 0x3de   : > { %v1081_v41 = vpop.eup %1080 }
 0x3df   : > { %v731_v42 = vmul.f32 %v1079_v35, %v730_v40  ;;  %v737_v45 = vmul.f32 %v1081_v41, %v725_v37  ;;  %vm743_vm9 = vweird.f32 %v1081_v41 }
 0x3e0   : > { %vm744_vm11 = vmor %vm742_vm10, %vm743_vm9 }
 0x3e1   : > { %v735_v46 = vsel %vm734_vm8, %v1079_v35, %v731_v42  ;;  %v738_v48 = vmul.f32 %v1081_v41, %v737_v45 }
 0x3e2   : > { %v746_v47 = vmul.f32 %v735_v46, %v722_v43 }
 0x3e3   : > { %v739_v51 = vmul.f32 0.5, %v738_v48 }
 0x3e4   : > { %v752_v50 = vmul.f32 %v1073_v44, %v746_v47 }
 0x3e5   : > { %v740_v52 = vsub.f32 1.5, %v739_v51 }
 0x3e6   : > { %v758_v53 = vadd.f32 %v1074_v49, %v752_v50 }
 0x3e7   : > { %v741_v54 = vmul.f32 %v1081_v41, %v740_v52 }
 0x3e8   : > { %v760_v55 = vsel %vm440_vm1, %v758_v53, 0.0 }
 0x3e9   : > { %v761_v57 = vrot.slane %v760_v55, 4  ;;  %v745_v58 = vsel %vm744_vm11, %v1081_v41, %v741_v54 }
 0x3ea   : > { %v747_v59 = vmul.f32 %v745_v58, %v723_v56 }
 0x3eb   : > { %v762_v60 = vadd.f32 %v761_v57, %v760_v55 }
 0x3ec   : > { %v753_v61 = vmul.f32 %v1073_v44, %v747_v59 }
 0x3ed   : > { %v763_v62 = vrot.slane %v762_v60, 2 }
 0x3ee   : > { %v759_v63 = vadd.f32 %v1074_v49, %v753_v61 }
 0x3ef   : > { %v764_v2 = vadd.f32 %v763_v62, %v762_v60 }
 0x3f0   : > { %v767_v3 = vsel %vm440_vm1, %v759_v63, 0.0 }
 0x3f1   : > { %v765_v4 = vrot.slane %v764_v2, 1  ;;  %v768_v5 = vrot.slane %v767_v3, 4 }
 0x3f3   : > { %v769_v6 = vadd.f32 %v768_v5, %v767_v3  ;;  %v766_v7 = vadd.f32 %v765_v4, %v764_v2 }
 0x3f5   : > { %v770_v9 = vrot.slane %v769_v6, 2  ;;  %v774_v12 = vmax.f32 %v766_v7, 0.0 }
 0x3f7   : > { %v771_v10 = vadd.f32 %v770_v9, %v769_v6  ;;  %v776_v13 = vpack.c.bf16 %v774_v12, %v774_v12 }
 0x3f9   : > { %v772_v11 = vrot.slane %v771_v10, 1  ;;  %v788_v1 = vunpack.c.l.b16 %v776_v13 }
 0x3fb   : > { %v773_v8 = vadd.f32 %v772_v11, %v771_v10 }
 0x3fd   : > { %v775_v0 = vmax.f32 %v773_v8, 0.0 }
 0x3ff   : > { %v777_v14 = vpack.c.bf16 %v775_v0, %v775_v0 }
 0x401   : > { %v789_v15 = vunpack.c.l.b16 %v777_v14 }
 0x403   : > { %v791_v16 = vsel %vm790_vm12, %v789_v15, %v788_v1 }
 0x404   : > { %v792_v17 = vpack.c.b16 %v791_v16, %v791_v16 }
 0x406   : > { %1002 = vmatmul.msk.bf16.vlgmr.msra.gmra.mxu0 %vm440_vm1, %v792_v17 }
 0x483   : > { %v817_v19 = vpop.f32.mrf.mxu0 }
 0x484   : > { %v818_v20 = vadd.f32 %v1075_v18, %v817_v19 }
 0x486   : > { %821 = vst [vmem:[#allocation8] sm:$0x3] %v818_v20 }
 0x48b   : > { %v819_v21 = vpop.f32.mrf.mxu0 }
 0x48c PF: > { %p1046_p9 = scmp.eq.s32.totalorder %s1258_s13, 7  ;;  %s1198_s28 = smov [#allocation8]  }
 0x48d   : > { %s828_s29 = sshll.u32 %s1198_s28, 4  ;;  %s830_s12 = sshll.u32 %s1374_s9, 4  ;;  %s829_s29 = int_to_ptr.vmem [resolvable:$true] %s828_s29  ;;  %s831_s12 = int_to_ptr.hbm [resolvable:$true] %s830_s12 }
 0x48e   : > { %1032 = dma.vmem_to_hbm [thread:$0]  (%p1046_p9), %s829_s29, 32, %s831_s12, [#allocation5]  }
 0x48f   : > { %1183 = dma.done.wait (%p1046_p9), [#allocation5], 32  }
 0x490   : > { %1185 = vsyncadd (%p1046_p9), [#allocation5], 4294967264 }
 0x491 PF: > { %s22_s30 = sadd.s32 1, %s1188_s30  }
 0x492   : > { %p19_p10 = scmp.ge.s32.totalorder %s22_s30, 10  }
 0x494   :  { %21 = sbr.rel (!%p19_p10) target bundleno = 3 (0x3), region = 109 }
 0x499   :  { %844 = vsyncpa [#allocation4], 1 }
 0x49a   :  { %846 = vsyncpa [#allocation4 + $0x1], 1 }
 0x49b   :  { %847 = vsyncpa [#allocation7], 1 }
 0x49c   :  { %848 = vsyncpa [#allocation5], 1 }
 0x49d   :  { %850 = vsyncpa [#allocation5 + $0x1], 1 }

</bundles_post_ra>
